<compile_context>
chip_gen: v6e
topology: v6e:2x2x1
jax: 0.10.0
libtpu: 0.0.40
codegen_flags: <defaults>
</compile_context>

<pallas_src>
import jax
import jax.numpy as jnp
from jax import lax
from jax.experimental import pallas as pl
from jax.experimental.pallas import tpu as pltpu


def mlp_kernel(x_ref, w1_ref, b1_ref, w2_ref, b2_ref, w3t_ref, b3_ref, o_ref):
    # x_ref: (TM, input_size) f32; weights bf16; biases f32; output f32.
    x = x_ref[...].astype(jnp.bfloat16)                            # in-kernel cast (VPU)

    # Layer 1: Linear(input_size, 128) + ReLU  (bf16 operands, f32 accumulate)
    h1 = jnp.dot(x, w1_ref[...], preferred_element_type=jnp.float32)
    h1 = jnp.maximum(h1 + b1_ref[...], 0.0)                        # (TM, 128) f32

    # Layer 2: Linear(128, 128) + ReLU
    h2 = jnp.dot(h1.astype(jnp.bfloat16), w2_ref[...],
                 preferred_element_type=jnp.float32)
    h2 = jnp.maximum(h2 + b2_ref[...], 0.0)                        # (TM, 128) f32

    # Layer 3: Linear(128, 1).  Contract w3t (1,128) with h2 (TM,128) on the feature
    # axis -> (1, TM).  Same dimension_numbers as q@k^T in flash attention, so it is
    # an MXU matmul (no explicit transpose), and the output block stays lane-dense.
    o_row = lax.dot_general(
        w3t_ref[...], h2.astype(jnp.bfloat16),
        dimension_numbers=(((1,), (1,)), ((), ())),
        preferred_element_type=jnp.float32)                        # (1, TM)
    o_ref[0] = (o_row + b3_ref[0, 0]).astype(o_ref.dtype)


def _round_up(n, m):
    return ((n + m - 1) // m) * m


def _vmem_budget_bytes():
    """Generation-aware usable-VMEM budget for tiling decisions."""
    try:
        kind = jax.devices()[0].device_kind.lower()
    except Exception:
        kind = ""
    if any(tag in kind for tag in ("v4", "v5", "v6")):
        return 96 << 20        # 128 MiB physical VMEM per core
    return 40 << 20            # conservative (v7x: 64 MiB physical per TensorCore)


def _pick_tm(batch, input_size, budget, tm_target):
    """Pick the batch tile: big to amortize the ~0.35us/step overhead, but clamped
    for small batches, split for v7x dual-TC, and shrunk to fit the VMEM budget."""
    tm = min(tm_target, _round_up(batch, 8))               # small-batch clamp
    if batch >= 32:                                        # keep >= 2 grid steps (v7x 2 TCs)
        tm = min(tm, _round_up((batch + 1) // 2, 16))
    tm = max(tm, 8)

    def vmem_need(t):
        return (2 * t * input_size * 4          # x tile (f32), double-buffered
                + input_size * 128 * 2          # w1 bf16, single-buffered
                + 2 * 128 * 128 * 2             # w2 (+ slack)
                + 8 * 128 * 4                   # b1/b2/w3
                + 6 * t * 128 * 4               # h1/h2 f32 + bf16 temporaries (slack)
                + 2 * t * 4)                    # output tile, double-buffered

    while tm > 16 and vmem_need(tm) > budget:
        tm = max(16, _round_up(tm // 2, 16))
    if vmem_need(tm) > budget:
        # TODO(synk): fall back to a K-tiled accumulator kernel for huge input_size.
        raise ValueError(
            f"input_size={input_size} too large for the resident-w1 kernel "
            f"(needs {vmem_need(tm)} B > budget {budget} B)")
    return tm


def _build_call(input_size, tm, grid_steps, vmem_limit, single_buffer_weights):
    # Weights/biases have constant index_maps; single-buffer them to save VMEM.
    const_kw = dict(pipeline_mode=pl.Buffered(1)) if single_buffer_weights else {}
    in_specs = [
        pl.BlockSpec((tm, input_size), lambda i: (i, 0)),               # x (pipelined, f32)
        pl.BlockSpec((input_size, 128), lambda i: (0, 0), **const_kw),  # w1 (resident)
        pl.BlockSpec((1, 128), lambda i: (0, 0), **const_kw),           # b1
        pl.BlockSpec((128, 128), lambda i: (0, 0), **const_kw),         # w2
        pl.BlockSpec((1, 128), lambda i: (0, 0), **const_kw),           # b2
        pl.BlockSpec((1, 128), lambda i: (0, 0), **const_kw),           # w3 (stored [1,128])
        pl.BlockSpec(memory_space=pltpu.MemorySpace.SMEM),              # b3 scalar
    ]
    return pl.pallas_call(
        mlp_kernel,
        out_shape=jax.ShapeDtypeStruct((grid_steps, 1, tm), jnp.float32),
        grid=(grid_steps,),
        in_specs=in_specs,
        out_specs=pl.BlockSpec((1, 1, tm), lambda i: (i, 0, 0)),
        compiler_params=pltpu.CompilerParams(
            dimension_semantics=("parallel",),
            vmem_limit_bytes=vmem_limit,
        ),
    )


def nn_model_forward(x, params, *, tm=2048):
    """x: [B, input_size] float32.  params from init_params (bf16 weights).
    Returns [B, 1] float32."""
    w1, b1, w2, b2, w3t, b3 = params
    B, input_size = x.shape

    budget = _vmem_budget_bytes()
    tm = _pick_tm(B, input_size, budget, tm)
    G = pl.cdiv(B, tm)
    vmem_limit = int(min(budget + (8 << 20), 112 << 20))

    args = (x, w1, b1, w2, b2, w3t, b3)
    try:
        out = _build_call(input_size, tm, G, vmem_limit, True)(*args)
        out = jax.block_until_ready(out)
    except Exception:
        # Fallback if this Pallas build rejects pipeline_mode=pl.Buffered(1):
        # identical kernel with default (double-buffered) weight blocks.
        out = _build_call(input_size, tm, G, vmem_limit, False)(*args)

    # (G, 1, TM) lane-dense slab -> (B, 1); overhang rows (unspecified) sliced off.
    return out.reshape(G * tm, 1)[:B]


def init_params(input_size, key):
    """Deterministic init mimicking PyTorch's U(-1/sqrt(fan_in), 1/sqrt(fan_in)).
    Weights are pre-cast to bf16 once here (not per forward call); biases stay f32."""
    ks = jax.random.split(key, 6)

    def layer(kw, kb, fan_in, w_shape, b_shape):
        bound = 1.0 / jnp.sqrt(jnp.float32(fan_in))
        w = jax.random.uniform(kw, w_shape, jnp.float32, -bound, bound)
        b = jax.random.uniform(kb, b_shape, jnp.float32, -bound, bound)
        return w.astype(jnp.bfloat16), b

    w1, b1 = layer(ks[0], ks[1], input_size, (input_size, 128), (1, 128))
    w2, b2 = layer(ks[2], ks[3], 128, (128, 128), (1, 128))
    # last layer kept in PyTorch's [out, in] = [1, 128] layout; scalar bias as (1, 1)
    w3t, b3 = layer(ks[4], ks[5], 128, (1, 128), (1, 1))
    return (w1, b1, w2, b2, w3t, b3)


def ref_forward(x, params):
    """Reference with the same bf16-operand / f32-accumulate policy as the kernel."""
    w1, b1, w2, b2, w3t, b3 = params
    xb = x.astype(jnp.bfloat16)
    h1 = jnp.maximum(jnp.dot(xb, w1, preferred_element_type=jnp.float32) + b1, 0.0)
    h2 = jnp.maximum(jnp.dot(h1.astype(jnp.bfloat16), w2,
                             preferred_element_type=jnp.float32) + b2, 0.0)
    o = jnp.dot(h2.astype(jnp.bfloat16), w3t.T,
                preferred_element_type=jnp.float32) + b3
    return o


if __name__ == "__main__":
    key = jax.random.PRNGKey(0)
    kx, kp = jax.random.split(key)

    batch = 8
    input_size = 32
    x = jax.random.normal(kx, (batch, input_size), jnp.float32)
    params = init_params(input_size, kp)

    out = nn_model_forward(x, params)
    out = jax.block_until_ready(out)

    ref = ref_forward(x, params)
    assert out.shape == (batch, 1)
    assert jnp.allclose(out, ref, atol=1e-2, rtol=1e-2), "mismatch vs reference"

    print("KERNEL_OK")
</pallas_src>

<mosaic_0001>
module attributes {stable_mosaic.version = 11 : i64} {
  func.func @mlp_kernel(%arg0: i32, %arg1: memref<8x32xf32, #tpu.memory_space<vmem>>, %arg2: memref<32x128xbf16, #tpu.memory_space<vmem>>, %arg3: memref<1x128xf32, #tpu.memory_space<vmem>>, %arg4: memref<128x128xbf16, #tpu.memory_space<vmem>>, %arg5: memref<1x128xf32, #tpu.memory_space<vmem>>, %arg6: memref<1x128xbf16, #tpu.memory_space<vmem>>, %arg7: memref<1x1xf32, #tpu.memory_space<smem>>, %arg8: memref<1x1x8xf32, #tpu.memory_space<vmem>>) attributes {dimension_semantics = [#tpu.dimension_semantics<parallel>], iteration_bounds = array<i64: 1>, scalar_prefetch = 0 : i64, scratch_operands = 0 : i64, tpu.core_type = #tpu.core_type<tc>, window_params = [{transform_indices = @transform_0, window_bounds = array<i64: 8, 32>}, {pipeline_mode = #tpu.pipeline_mode<synchronous>, transform_indices = @transform_1, window_bounds = array<i64: 32, 128>}, {pipeline_mode = #tpu.pipeline_mode<synchronous>, transform_indices = @transform_2, window_bounds = array<i64: 1, 128>}, {pipeline_mode = #tpu.pipeline_mode<synchronous>, transform_indices = @transform_3, window_bounds = array<i64: 128, 128>}, {pipeline_mode = #tpu.pipeline_mode<synchronous>, transform_indices = @transform_4, window_bounds = array<i64: 1, 128>}, {pipeline_mode = #tpu.pipeline_mode<synchronous>, transform_indices = @transform_5, window_bounds = array<i64: 1, 128>}, {transform_indices = @transform_6, window_bounds = array<i64: 1, 1>}, {transform_indices = @transform_7, window_bounds = array<i64: 1, 1, 8>}]} {
    %c0 = arith.constant 0 : index
    %c0_0 = arith.constant 0 : index
    %0 = vector.load %arg1[%c0, %c0_0] : memref<8x32xf32, #tpu.memory_space<vmem>>, vector<8x32xf32>
    %1 = arith.truncf %0 : vector<8x32xf32> to vector<8x32xbf16>
    %c0_1 = arith.constant 0 : index
    %c0_2 = arith.constant 0 : index
    %2 = vector.load %arg2[%c0_1, %c0_2] : memref<32x128xbf16, #tpu.memory_space<vmem>>, vector<32x128xbf16>
    %cst = arith.constant dense<0.000000e+00> : vector<8x128xf32>
    %3 = tpu.matmul %1, %2, %cst {dimension_numbers = #tpu.dot_dimension_numbers<[1], [0], [0], [1], [0, 0, 1, 1], [], []>} : vector<8x32xbf16>, vector<32x128xbf16>, vector<8x128xf32> -> vector<8x128xf32>
    %c0_3 = arith.constant 0 : index
    %c0_4 = arith.constant 0 : index
    %4 = vector.load %arg3[%c0_3, %c0_4] : memref<1x128xf32, #tpu.memory_space<vmem>>, vector<1x128xf32>
    %5 = vector.broadcast %4 : vector<1x128xf32> to vector<8x128xf32>
    %6 = arith.addf %3, %5 : vector<8x128xf32>
    %cst_5 = arith.constant 0.000000e+00 : f32
    %7 = vector.broadcast %cst_5 : f32 to vector<8x128xf32>
    %8 = arith.maximumf %6, %7 : vector<8x128xf32>
    %9 = arith.truncf %8 : vector<8x128xf32> to vector<8x128xbf16>
    %c0_6 = arith.constant 0 : index
    %c0_7 = arith.constant 0 : index
    %10 = vector.load %arg4[%c0_6, %c0_7] : memref<128x128xbf16, #tpu.memory_space<vmem>>, vector<128x128xbf16>
    %cst_8 = arith.constant dense<0.000000e+00> : vector<8x128xf32>
    %11 = tpu.matmul %9, %10, %cst_8 {dimension_numbers = #tpu.dot_dimension_numbers<[1], [0], [0], [1], [0, 0, 1, 1], [], []>} : vector<8x128xbf16>, vector<128x128xbf16>, vector<8x128xf32> -> vector<8x128xf32>
    %c0_9 = arith.constant 0 : index
    %c0_10 = arith.constant 0 : index
    %12 = vector.load %arg5[%c0_9, %c0_10] : memref<1x128xf32, #tpu.memory_space<vmem>>, vector<1x128xf32>
    %13 = vector.broadcast %12 : vector<1x128xf32> to vector<8x128xf32>
    %14 = arith.addf %11, %13 : vector<8x128xf32>
    %cst_11 = arith.constant 0.000000e+00 : f32
    %15 = vector.broadcast %cst_11 : f32 to vector<8x128xf32>
    %16 = arith.maximumf %14, %15 : vector<8x128xf32>
    %c0_12 = arith.constant 0 : index
    %c0_13 = arith.constant 0 : index
    %17 = vector.load %arg6[%c0_12, %c0_13] : memref<1x128xbf16, #tpu.memory_space<vmem>>, vector<1x128xbf16>
    %18 = arith.truncf %16 : vector<8x128xf32> to vector<8x128xbf16>
    %cst_14 = arith.constant dense<0.000000e+00> : vector<1x8xf32>
    %19 = tpu.matmul %17, %18, %cst_14 {dimension_numbers = #tpu.dot_dimension_numbers<[1], [1], [0], [0], [0, 0, 1, 0], [], []>} : vector<1x128xbf16>, vector<8x128xbf16>, vector<1x8xf32> -> vector<1x8xf32>
    %c0_15 = arith.constant 0 : index
    %c0_16 = arith.constant 0 : index
    %20 = memref.load %arg7[%c0_15, %c0_16] : memref<1x1xf32, #tpu.memory_space<smem>>
    %21 = vector.broadcast %20 : f32 to vector<1x8xf32>
    %22 = arith.addf %19, %21 : vector<1x8xf32>
    %c0_17 = arith.constant 0 : index
    %c0_18 = arith.constant 0 : index
    %c0_19 = arith.constant 0 : index
    %23 = vector.load %arg8[%c0_17, %c0_18, %c0_19] : memref<1x1x8xf32, #tpu.memory_space<vmem>>, vector<1x1x8xf32>
    %24 = vector.shape_cast %23 : vector<1x1x8xf32> to vector<1x8xf32>
    %25 = vector.shape_cast %22 : vector<1x8xf32> to vector<1x1x8xf32>
    tpu.vector_store %arg8[%c0_17, %c0_18, %c0_19], %25 {strides = array<i32>} : memref<1x1x8xf32, #tpu.memory_space<vmem>>, vector<1x1x8xf32>,
    return
  }
  func.func @transform_0(%arg0: i32) -> (i32, i32) {
    %c0_i32 = arith.constant 0 : i32
    %c0_i32_0 = arith.constant 0 : i32
    return %arg0, %c0_i32 : i32, i32
  }
  func.func @transform_1(%arg0: i32) -> (i32, i32) {
    %c0_i32 = arith.constant 0 : i32
    %c0_i32_0 = arith.constant 0 : i32
    %c0_i32_1 = arith.constant 0 : i32
    return %c0_i32, %c0_i32_0 : i32, i32
  }
  func.func @transform_2(%arg0: i32) -> (i32, i32) {
    %c0_i32 = arith.constant 0 : i32
    %c0_i32_0 = arith.constant 0 : i32
    %c0_i32_1 = arith.constant 0 : i32
    return %c0_i32, %c0_i32_0 : i32, i32
  }
  func.func @transform_3(%arg0: i32) -> (i32, i32) {
    %c0_i32 = arith.constant 0 : i32
    %c0_i32_0 = arith.constant 0 : i32
    %c0_i32_1 = arith.constant 0 : i32
    return %c0_i32, %c0_i32_0 : i32, i32
  }
  func.func @transform_4(%arg0: i32) -> (i32, i32) {
    %c0_i32 = arith.constant 0 : i32
    %c0_i32_0 = arith.constant 0 : i32
    %c0_i32_1 = arith.constant 0 : i32
    return %c0_i32, %c0_i32_0 : i32, i32
  }
  func.func @transform_5(%arg0: i32) -> (i32, i32) {
    %c0_i32 = arith.constant 0 : i32
    %c0_i32_0 = arith.constant 0 : i32
    %c0_i32_1 = arith.constant 0 : i32
    return %c0_i32, %c0_i32_0 : i32, i32
  }
  func.func @transform_6(%arg0: i32) -> (i32, i32) {
    %c0_i32 = arith.constant 0 : i32
    %c0_i32_0 = arith.constant 0 : i32
    %c0_i32_1 = arith.constant 0 : i32
    return %c0_i32, %c0_i32_0 : i32, i32
  }
  func.func @transform_7(%arg0: i32) -> (i32, i32, i32) {
    %c0_i32 = arith.constant 0 : i32
    %c0_i32_0 = arith.constant 0 : i32
    %c0_i32_1 = arith.constant 0 : i32
    return %arg0, %c0_i32, %c0_i32_0 : i32, i32, i32
  }
}

module attributes {stable_mosaic.version = 11 : i64} {
  func.func @mlp_kernel(%arg0: i32, %arg1: memref<8x32xf32, #tpu.memory_space<vmem>>, %arg2: memref<32x128xbf16, #tpu.memory_space<vmem>>, %arg3: memref<1x128xf32, #tpu.memory_space<vmem>>, %arg4: memref<128x128xbf16, #tpu.memory_space<vmem>>, %arg5: memref<1x128xf32, #tpu.memory_space<vmem>>, %arg6: memref<1x128xbf16, #tpu.memory_space<vmem>>, %arg7: memref<1x1xf32, #tpu.memory_space<smem>>, %arg8: memref<1x1x8xf32, #tpu.memory_space<vmem>>) attributes {dimension_semantics = [#tpu.dimension_semantics<parallel>], iteration_bounds = array<i64: 1>, scalar_prefetch = 0 : i64, scratch_operands = 0 : i64, tpu.core_type = #tpu.core_type<tc>, window_params = [{transform_indices = @transform_0, window_bounds = array<i64: 8, 32>}, {pipeline_mode = #tpu.pipeline_mode<synchronous>, transform_indices = @transform_1, window_bounds = array<i64: 32, 128>}, {pipeline_mode = #tpu.pipeline_mode<synchronous>, transform_indices = @transform_2, window_bounds = array<i64: 1, 128>}, {pipeline_mode = #tpu.pipeline_mode<synchronous>, transform_indices = @transform_3, window_bounds = array<i64: 128, 128>}, {pipeline_mode = #tpu.pipeline_mode<synchronous>, transform_indices = @transform_4, window_bounds = array<i64: 1, 128>}, {pipeline_mode = #tpu.pipeline_mode<synchronous>, transform_indices = @transform_5, window_bounds = array<i64: 1, 128>}, {transform_indices = @transform_6, window_bounds = array<i64: 1, 1>}, {transform_indices = @transform_7, window_bounds = array<i64: 1, 1, 8>}]} {
    %c0 = arith.constant 0 : index
    %c0_0 = arith.constant 0 : index
    %0 = vector.load %arg1[%c0, %c0_0] : memref<8x32xf32, #tpu.memory_space<vmem>>, vector<8x32xf32>
    %1 = arith.truncf %0 : vector<8x32xf32> to vector<8x32xbf16>
    %c0_1 = arith.constant 0 : index
    %c0_2 = arith.constant 0 : index
    %2 = vector.load %arg2[%c0_1, %c0_2] : memref<32x128xbf16, #tpu.memory_space<vmem>>, vector<32x128xbf16>
    %cst = arith.constant dense<0.000000e+00> : vector<8x128xf32>
    %3 = tpu.matmul %1, %2, %cst {dimension_numbers = #tpu.dot_dimension_numbers<[1], [0], [0], [1], [0, 0, 1, 1], [], []>} : vector<8x32xbf16>, vector<32x128xbf16>, vector<8x128xf32> -> vector<8x128xf32>
    %c0_3 = arith.constant 0 : index
    %c0_4 = arith.constant 0 : index
    %4 = vector.load %arg3[%c0_3, %c0_4] : memref<1x128xf32, #tpu.memory_space<vmem>>, vector<1x128xf32>
    %5 = vector.broadcast %4 : vector<1x128xf32> to vector<8x128xf32>
    %6 = arith.addf %3, %5 : vector<8x128xf32>
    %cst_5 = arith.constant 0.000000e+00 : f32
    %7 = vector.broadcast %cst_5 : f32 to vector<8x128xf32>
    %8 = arith.maximumf %6, %7 : vector<8x128xf32>
    %9 = arith.truncf %8 : vector<8x128xf32> to vector<8x128xbf16>
    %c0_6 = arith.constant 0 : index
    %c0_7 = arith.constant 0 : index
    %10 = vector.load %arg4[%c0_6, %c0_7] : memref<128x128xbf16, #tpu.memory_space<vmem>>, vector<128x128xbf16>
    %cst_8 = arith.constant dense<0.000000e+00> : vector<8x128xf32>
    %11 = tpu.matmul %9, %10, %cst_8 {dimension_numbers = #tpu.dot_dimension_numbers<[1], [0], [0], [1], [0, 0, 1, 1], [], []>} : vector<8x128xbf16>, vector<128x128xbf16>, vector<8x128xf32> -> vector<8x128xf32>
    %c0_9 = arith.constant 0 : index
    %c0_10 = arith.constant 0 : index
    %12 = vector.load %arg5[%c0_9, %c0_10] : memref<1x128xf32, #tpu.memory_space<vmem>>, vector<1x128xf32>
    %13 = vector.broadcast %12 : vector<1x128xf32> to vector<8x128xf32>
    %14 = arith.addf %11, %13 : vector<8x128xf32>
    %cst_11 = arith.constant 0.000000e+00 : f32
    %15 = vector.broadcast %cst_11 : f32 to vector<8x128xf32>
    %16 = arith.maximumf %14, %15 : vector<8x128xf32>
    %c0_12 = arith.constant 0 : index
    %c0_13 = arith.constant 0 : index
    %17 = vector.load %arg6[%c0_12, %c0_13] : memref<1x128xbf16, #tpu.memory_space<vmem>>, vector<1x128xbf16>
    %18 = arith.truncf %16 : vector<8x128xf32> to vector<8x128xbf16>
    %cst_14 = arith.constant dense<0.000000e+00> : vector<1x8xf32>
    %19 = tpu.matmul %17, %18, %cst_14 {dimension_numbers = #tpu.dot_dimension_numbers<[1], [1], [0], [0], [0, 0, 1, 0], [], []>} : vector<1x128xbf16>, vector<8x128xbf16>, vector<1x8xf32> -> vector<1x8xf32>
    %c0_15 = arith.constant 0 : index
    %c0_16 = arith.constant 0 : index
    %20 = memref.load %arg7[%c0_15, %c0_16] : memref<1x1xf32, #tpu.memory_space<smem>>
    %21 = vector.broadcast %20 : f32 to vector<1x8xf32>
    %22 = arith.addf %19, %21 : vector<1x8xf32>
    %c0_17 = arith.constant 0 : index
    %c0_18 = arith.constant 0 : index
    %c0_19 = arith.constant 0 : index
    %23 = vector.load %arg8[%c0_17, %c0_18, %c0_19] : memref<1x1x8xf32, #tpu.memory_space<vmem>>, vector<1x1x8xf32>
    %24 = vector.shape_cast %23 : vector<1x1x8xf32> to vector<1x8xf32>
    %25 = vector.shape_cast %22 : vector<1x8xf32> to vector<1x1x8xf32>
    tpu.vector_store %arg8[%c0_17, %c0_18, %c0_19], %25 {strides = array<i32>} : memref<1x1x8xf32, #tpu.memory_space<vmem>>, vector<1x1x8xf32>,
    return
  }
  func.func @transform_0(%arg0: i32) -> (i32, i32) {
    %c0_i32 = arith.constant 0 : i32
    %c0_i32_0 = arith.constant 0 : i32
    return %arg0, %c0_i32 : i32, i32
  }
  func.func @transform_1(%arg0: i32) -> (i32, i32) {
    %c0_i32 = arith.constant 0 : i32
    %c0_i32_0 = arith.constant 0 : i32
    %c0_i32_1 = arith.constant 0 : i32
    return %c0_i32, %c0_i32_0 : i32, i32
  }
  func.func @transform_2(%arg0: i32) -> (i32, i32) {
    %c0_i32 = arith.constant 0 : i32
    %c0_i32_0 = arith.constant 0 : i32
    %c0_i32_1 = arith.constant 0 : i32
    return %c0_i32, %c0_i32_0 : i32, i32
  }
  func.func @transform_3(%arg0: i32) -> (i32, i32) {
    %c0_i32 = arith.constant 0 : i32
    %c0_i32_0 = arith.constant 0 : i32
    %c0_i32_1 = arith.constant 0 : i32
    return %c0_i32, %c0_i32_0 : i32, i32
  }
  func.func @transform_4(%arg0: i32) -> (i32, i32) {
    %c0_i32 = arith.constant 0 : i32
    %c0_i32_0 = arith.constant 0 : i32
    %c0_i32_1 = arith.constant 0 : i32
    return %c0_i32, %c0_i32_0 : i32, i32
  }
  func.func @transform_5(%arg0: i32) -> (i32, i32) {
    %c0_i32 = arith.constant 0 : i32
    %c0_i32_0 = arith.constant 0 : i32
    %c0_i32_1 = arith.constant 0 : i32
    return %c0_i32, %c0_i32_0 : i32, i32
  }
  func.func @transform_6(%arg0: i32) -> (i32, i32) {
    %c0_i32 = arith.constant 0 : i32
    %c0_i32_0 = arith.constant 0 : i32
    %c0_i32_1 = arith.constant 0 : i32
    return %c0_i32, %c0_i32_0 : i32, i32
  }
  func.func @transform_7(%arg0: i32) -> (i32, i32, i32) {
    %c0_i32 = arith.constant 0 : i32
    %c0_i32_0 = arith.constant 0 : i32
    %c0_i32_1 = arith.constant 0 : i32
    return %arg0, %c0_i32, %c0_i32_0 : i32, i32, i32
  }
}

</mosaic_0001>

<bundles_post_ra>
// kernel: tpu_custom_call.1
= control target key start
LH: loop header
LB: loop body
LE: loop exit
PB: predicated region body
PF: predicated region fallthrough
CT: control target
= control target key end

     0   :  { %13 = vsyncpa [#allocation4], 0  ;;  %s553_s0 = inlined_call_operand.hbm [shape: f32[8,32], index: 0, kind: input, shape index: {}]   ;;  %s554_s1 = inlined_call_operand.hbm [shape: bf16[32,128], index: 1, kind: input, shape index: {}]   ;;  %s555_s2 = inlined_call_operand.vmem [shape: f32[1,128], index: 2, kind: input, shape index: {}]   ;;  %s556_s3 = inlined_call_operand.hbm [shape: bf16[128,128], index: 3, kind: input, shape index: {}]   ;;  %s557_s4 = inlined_call_operand.vmem [shape: f32[1,128], index: 4, kind: input, shape index: {}]   ;;  %s558_s5 = inlined_call_operand.vmem [shape: bf16[1,128], index: 5, kind: input, shape index: {}]   ;;  %s559_s6 = inlined_call_operand.<no memory space> [shape: f32[1,1], index: 6, kind: input, shape index: {}]   ;;  %s560_s7 = inlined_call_operand.hbm [shape: f32[1,1,8], index: 7, kind: output, shape index: {}]  }
   0x1   :  { %14 = vsyncpa [#allocation7], 0 }
   0x2   :  { %15 = vsyncpa [#allocation5], 0  ;;  %s478_s24 = smov [#allocation6]  }
   0x3   :  { %s31_s25 = sshll.u32 %s478_s24, 4  ;;  %s32_s25 = int_to_ptr.vmem [resolvable:$true] %s31_s25 }
   0x4   :  { %s400_s26 = scalar_lea.vmem %s32_s25, 256  ;;  %p405_p1 = scmp.lt.s32.totalorder %s32_s25, %s32_s25 }
   0x5   :  { %p401_p0 = scmp.ne.s32.totalorder %s32_s25, %s400_s26  ;;  %p406_p2 = scmp.lt.s32.totalorder %s400_s26, %s400_s26 }
   0x7   :  { %p407_p3 = por %p406_p2, %p405_p1 }
   0x9   :  { %p408_p4 = pnand %p407_p3, %p401_p0 }
   0xb   :  { %411 = shalt.err (!%p408_p4)
}
   0xc   :  { %s479_s27 = smov 64   ;;  %s480_s28 = smov 4  }
   0xd   :  { %37 = dma.hbm_to_vmem [thread:$0]  %s554_s1, 256, %s32_s25, [#allocation7], %s479_s27, %s479_s27, %s480_s28  }
   0xe   :  { %s481_s8 = smov [#allocation3]   ;;  %s482_s10 = smov [#allocation8]  }
   0xf   :  { %s22_s9 = sshll.u32 %s481_s8, 4  ;;  %s45_s11 = sshll.u32 %s482_s10, 4  ;;  %s23_s9 = int_to_ptr.vmem [resolvable:$true] %s22_s9  ;;  %s46_s11 = int_to_ptr.vmem [resolvable:$true] %s45_s11 }
  0x10   :  { %s420_s12 = scalar_lea.vmem %s23_s9, 128  ;;  %p425_p6 = scmp.lt.s32.totalorder %s23_s9, %s23_s9 }
  0x11   :  { %p421_p5 = scmp.ne.s32.totalorder %s23_s9, %s420_s12  ;;  %p426_p7 = scmp.lt.s32.totalorder %s420_s12, %s420_s12 }
  0x13   :  { %p427_p8 = por %p426_p7, %p425_p6 }
  0x15   :  { %p428_p9 = pnand %p427_p8, %p421_p5 }
  0x17   :  { %431 = shalt.err (!%p428_p9)
}
  0x18   :  { %25 = dma.hbm_to_vmem [thread:$0]  %s553_s0, 128, %s23_s9, [#allocation4]  }
  0x19   :  { %s440_s15 = scalar_lea.vmem %s46_s11, 1024  ;;  %p445_p11 = scmp.lt.s32.totalorder %s46_s11, %s46_s11 }
  0x1a   :  { %p441_p10 = scmp.ne.s32.totalorder %s46_s11, %s440_s15  ;;  %p446_p12 = scmp.lt.s32.totalorder %s440_s15, %s440_s15 }
  0x1c   :  { %p447_p13 = por %p446_p12, %p445_p11 }
  0x1e   :  { %p448_p0 = pnand %p447_p13, %p441_p10 }
  0x20   :  { %451 = shalt.err (!%p448_p0)
}
  0x21   :  { %51 = dma.hbm_to_vmem [thread:$0]  %s556_s3, 1024, %s46_s11, [#allocation7], %s479_s27, %s479_s27, %s480_s28  }
  0x22   :  { %472 = dma.done.wait [#allocation4], 128  }
  0x23   :  { %473 = vsyncadd [#allocation4], 4294967168 }
  0x24   :  { %474 = dma.done.wait [#allocation7], 1280  }
  0x25   :  { %475 = vsyncadd [#allocation7], 4294966016  ;;  %v483_v0 = vmov 0.0   ;;  %vm484_vm0 = vmmov 0   ;;  %v382_v1 = vld [vmem:[#allocation6 + $0x8] sm:$0xff]   ;;  %v383_v2 = vld [vmem:[#allocation6] sm:$0xff]   ;;  %v254_v30 = vstv %s559_s6 }
  0x26   :  { %340 = vmatprep.subr.bf16.mxu0 %v483_v0  ;;  %344 = vmatprep.mubr.msk.bf16.mxu0 %vm484_vm0, %v483_v0  ;;  %v68_v3 = vld [vmem:[#allocation3] sm:$0xff]  ;;  %v384_v4 = vld [vmem:[#allocation8 + $0x38] sm:$0xff]   ;;  %v385_v6 = vld [vmem:[#allocation8 + $0x30] sm:$0xff]   ;;  %vm93_vm1 = vcmask 261120   ;;  %s485_s22 = smov [#allocation9]   ;;  %vm295_vm2 = vcmask 57344  }
  0x27   :  { %348 = vmatprep.subr.bf16.mxu1 %v483_v0  ;;  %364 = vmatprep.mubr.msk.bf16.mxu1 %vm484_vm0, %v483_v0  ;;  %v69_v5 = vpack.c.bf16 %v68_v3, %v68_v3  ;;  %v386_v7 = vld [vmem:[#allocation8 + $0x28] sm:$0xff]   ;;  %v387_v8 = vld [vmem:[#allocation8 + $0x20] sm:$0xff]   ;;  %v388_v9 = vld [vmem:[#allocation8 + $0x18] sm:$0xff]   ;;  %s303_s23 = sshll.u32 %s485_s22, 4  ;;  %s304_s23 = int_to_ptr.vmem [resolvable:$true] %s303_s23 }
  0x28   :  { %341 = vmatpush3.bf16.msra.mxu0 %v382_v1  ;;  %349 = vmatpush3.bf16.msra.mxu1 %v384_v4  ;;  %v389_v10 = vld [vmem:[#allocation8 + $0x10] sm:$0xff]   ;;  %v390_v11 = vld [vmem:[#allocation8 + $0x8] sm:$0xff]   ;;  %v391_v12 = vld [vmem:[#allocation8] sm:$0xff]   ;;  %s456_s24 = scalar_lea.vmem %s304_s23, 32  ;;  %p457_p2 = scmp.lt.s32.totalorder %s304_s23, %s304_s23 }
  0x29   :  { %342 = vmatprep.subr.bf16.mxu0 %v483_v0  ;;  %350 = vmatprep.subr.bf16.mxu1 %v483_v0  ;;  %v313_v13 = vld [vmem:[%s555_s2] ss:$0 sm:$0xff] }
  0x2a   :  { %v317_v21 = vld [vmem:[%s557_s4] ss:$0 sm:$0xff]  ;;  %s452_s4 = scalar_lea.vmem %s304_s23, 16 }
  0x2b   :  { %v251_v29 = vld [vmem:[%s558_s5] sm:$0x1]  ;;  %p453_p1 = scmp.ne.s32.totalorder %s304_s23, %s452_s4  ;;  %p458_p3 = scmp.lt.s32.totalorder %s456_s24, %s452_s4 }
  0x2c   :  { %343 = vmatpush3.bf16.msra.mxu0 %v383_v2  ;;  %351 = vmatpush3.bf16.msra.mxu1 %v385_v6 }
  0x2d   :  { %368 = vmatprep.subr.bf16.mxu0 %v483_v0  ;;  %352 = vmatprep.subr.bf16.mxu1 %v483_v0  ;;  %p459_p4 = por %p458_p3, %p457_p2 }
  0x2f   :  { %345 = vmatmul.mubr.msk.bf16.vlgmr.msra.gmra.mxu0 %vm93_vm1, %v69_v5  ;;  %p460_p5 = pnand %p459_p4, %p453_p1 }
  0x30   :  { %370 = vmatprep.mubr.msk.bf16.mxu0 %vm484_vm0, %v483_v0  ;;  %353 = vmatpush3.bf16.msra.mxu1 %v386_v7 }
  0x31   :  { %354 = vmatprep.subr.bf16.mxu1 %v483_v0 }
  0x34   :  { %355 = vmatpush3.bf16.msra.mxu1 %v387_v8 }
  0x35   :  { %356 = vmatprep.subr.bf16.mxu1 %v483_v0 }
  0x38   :  { %357 = vmatpush3.bf16.msra.mxu1 %v388_v9 }
  0x39   :  { %358 = vmatprep.subr.bf16.mxu1 %v483_v0 }
  0x3c   :  { %359 = vmatpush3.bf16.msra.mxu1 %v389_v10 }
  0x3d   :  { %360 = vmatprep.subr.bf16.mxu1 %v483_v0 }
  0x40   :  { %361 = vmatpush3.bf16.msra.mxu1 %v390_v11 }
  0x41   :  { %362 = vmatprep.subr.bf16.mxu1 %v483_v0 }
  0x44   :  { %363 = vmatpush3.bf16.msra.mxu1 %v391_v12 }
  0xef   :  { %v131_v14 = vpop.f32.mrf.mxu0 }
  0xf0   :  { %v132_v15 = vadd.f32 %v313_v13, %v131_v14 }
  0xf1   :  { %v346_v16 = vpop.f32.mrf.mxu0 }
  0xf2   :  { %v137_v17 = vmax.f32 %v132_v15, 0.0 }
  0xf3   :  { %v134_v18 = vpop.f32.mrf.mxu0 }
  0xf4   :  { %v138_v19 = vpack.c.bf16 %v137_v17, %v137_v17 }
  0xf5   :  { %v347_v20 = vpop.f32.mrf.mxu0 }
  0xf6   :  { %365 = vmatmul.mubr.bf16.vlgmr.msra.gmra.mxu1 %v138_v19 }
 0x1b6   :  { %v244_v22 = vpop.f32.mrf.mxu1 }
 0x1b7   :  { %v245_v23 = vadd.f32 %v317_v21, %v244_v22 }
 0x1b8   :  { %v366_v24 = vpop.f32.mrf.mxu1 }
 0x1b9   :  { %v250_v25 = vmax.f32 %v245_v23, 0.0 }
 0x1ba   :  { %v247_v26 = vpop.f32.mrf.mxu1 }
 0x1bb   :  { %v252_v27 = vpack.c.bf16 %v250_v25, %v250_v25 }
 0x1bc   :  { %v367_v28 = vpop.f32.mrf.mxu1 }
 0x1bd   :  { %369 = vmatpush3.bf16.xpose.msra.mxu0 %v252_v27 }
 0x1c4   :  { %371 = vmatmul.mubr.bf16.vlgmr.msra.gmra.mxu0 %v251_v29 }
 0x284   :  { %v289_v31 = vpop.f32.mrf.mxu0 }
 0x285   :  { %v290_v32 = vadd.f32 %v289_v31, %v254_v30 }
 0x286   :  { %v372_v33 = vpop.f32.mrf.mxu0 }
 0x287   :  { %296 = vst.msk [vmem:[#allocation9] sm:$0x1] %vm295_vm2, %v290_v32 }
 0x288   :  { %v292_v34 = vpop.f32.mrf.mxu0 }
 0x289   :  { %463 = shalt.err (!%p460_p5)
}
 0x28a   :  { %306 = dma.vmem_to_hbm [thread:$0]  %s304_s23, 16, %s560_s7, [#allocation5]   ;;  %v373_v35 = vpop.f32.mrf.mxu0 }
 0x28b   :  { %476 = dma.done.wait [#allocation5], 16  }
 0x28c   :  { %477 = vsyncadd [#allocation5], 4294967280 }
 0x28d   :  { %310 = vsyncpa [#allocation4], 1 }
 0x28e   :  { %311 = vsyncpa [#allocation7], 1 }
 0x28f   :  { %312 = vsyncpa [#allocation5], 1 }

// kernel: tpu_custom_call.1
= control target key start
LH: loop header
LB: loop body
LE: loop exit
PB: predicated region body
PF: predicated region fallthrough
CT: control target
= control target key end

     0   :  { %13 = vsyncpa [#allocation4], 0  ;;  %s553_s0 = inlined_call_operand.hbm [shape: f32[8,32], index: 0, kind: input, shape index: {}]   ;;  %s554_s1 = inlined_call_operand.hbm [shape: bf16[32,128], index: 1, kind: input, shape index: {}]   ;;  %s555_s2 = inlined_call_operand.vmem [shape: f32[1,128], index: 2, kind: input, shape index: {}]   ;;  %s556_s3 = inlined_call_operand.hbm [shape: bf16[128,128], index: 3, kind: input, shape index: {}]   ;;  %s557_s4 = inlined_call_operand.vmem [shape: f32[1,128], index: 4, kind: input, shape index: {}]   ;;  %s558_s5 = inlined_call_operand.vmem [shape: bf16[1,128], index: 5, kind: input, shape index: {}]   ;;  %s559_s6 = inlined_call_operand.<no memory space> [shape: f32[1,1], index: 6, kind: input, shape index: {}]   ;;  %s560_s7 = inlined_call_operand.hbm [shape: f32[1,1,8], index: 7, kind: output, shape index: {}]  }
   0x1   :  { %14 = vsyncpa [#allocation7], 0 }
   0x2   :  { %15 = vsyncpa [#allocation5], 0  ;;  %s478_s24 = smov [#allocation6]  }
   0x3   :  { %s31_s25 = sshll.u32 %s478_s24, 4  ;;  %s32_s25 = int_to_ptr.vmem [resolvable:$true] %s31_s25 }
   0x4   :  { %s400_s26 = scalar_lea.vmem %s32_s25, 256  ;;  %p405_p1 = scmp.lt.s32.totalorder %s32_s25, %s32_s25 }
   0x5   :  { %p401_p0 = scmp.ne.s32.totalorder %s32_s25, %s400_s26  ;;  %p406_p2 = scmp.lt.s32.totalorder %s400_s26, %s400_s26 }
   0x7   :  { %p407_p3 = por %p406_p2, %p405_p1 }
   0x9   :  { %p408_p4 = pnand %p407_p3, %p401_p0 }
   0xb   :  { %411 = shalt.err (!%p408_p4)
}
   0xc   :  { %s479_s27 = smov 64   ;;  %s480_s28 = smov 4  }
   0xd   :  { %37 = dma.hbm_to_vmem [thread:$0]  %s554_s1, 256, %s32_s25, [#allocation7], %s479_s27, %s479_s27, %s480_s28  }
   0xe   :  { %s481_s8 = smov [#allocation3]   ;;  %s482_s10 = smov [#allocation8]  }
   0xf   :  { %s22_s9 = sshll.u32 %s481_s8, 4  ;;  %s45_s11 = sshll.u32 %s482_s10, 4  ;;  %s23_s9 = int_to_ptr.vmem [resolvable:$true] %s22_s9  ;;  %s46_s11 = int_to_ptr.vmem [resolvable:$true] %s45_s11 }
  0x10   :  { %s420_s12 = scalar_lea.vmem %s23_s9, 128  ;;  %p425_p6 = scmp.lt.s32.totalorder %s23_s9, %s23_s9 }
  0x11   :  { %p421_p5 = scmp.ne.s32.totalorder %s23_s9, %s420_s12  ;;  %p426_p7 = scmp.lt.s32.totalorder %s420_s12, %s420_s12 }
  0x13   :  { %p427_p8 = por %p426_p7, %p425_p6 }
  0x15   :  { %p428_p9 = pnand %p427_p8, %p421_p5 }
  0x17   :  { %431 = shalt.err (!%p428_p9)
}
  0x18   :  { %25 = dma.hbm_to_vmem [thread:$0]  %s553_s0, 128, %s23_s9, [#allocation4]  }
  0x19   :  { %s440_s15 = scalar_lea.vmem %s46_s11, 1024  ;;  %p445_p11 = scmp.lt.s32.totalorder %s46_s11, %s46_s11 }
  0x1a   :  { %p441_p10 = scmp.ne.s32.totalorder %s46_s11, %s440_s15  ;;  %p446_p12 = scmp.lt.s32.totalorder %s440_s15, %s440_s15 }
  0x1c   :  { %p447_p13 = por %p446_p12, %p445_p11 }
  0x1e   :  { %p448_p0 = pnand %p447_p13, %p441_p10 }
  0x20   :  { %451 = shalt.err (!%p448_p0)
}
  0x21   :  { %51 = dma.hbm_to_vmem [thread:$0]  %s556_s3, 1024, %s46_s11, [#allocation7], %s479_s27, %s479_s27, %s480_s28  }
  0x22   :  { %472 = dma.done.wait [#allocation4], 128  }
  0x23   :  { %473 = vsyncadd [#allocation4], 4294967168 }
  0x24   :  { %474 = dma.done.wait [#allocation7], 1280  }
  0x25   :  { %475 = vsyncadd [#allocation7], 4294966016  ;;  %v483_v0 = vmov 0.0   ;;  %vm484_vm0 = vmmov 0   ;;  %v382_v1 = vld [vmem:[#allocation6 + $0x8] sm:$0xff]   ;;  %v383_v2 = vld [vmem:[#allocation6] sm:$0xff]   ;;  %v254_v30 = vstv %s559_s6 }
  0x26   :  { %340 = vmatprep.subr.bf16.mxu0 %v483_v0  ;;  %344 = vmatprep.mubr.msk.bf16.mxu0 %vm484_vm0, %v483_v0  ;;  %v68_v3 = vld [vmem:[#allocation3] sm:$0xff]  ;;  %v384_v4 = vld [vmem:[#allocation8 + $0x38] sm:$0xff]   ;;  %v385_v6 = vld [vmem:[#allocation8 + $0x30] sm:$0xff]   ;;  %vm93_vm1 = vcmask 261120   ;;  %s485_s22 = smov [#allocation9]   ;;  %vm295_vm2 = vcmask 57344  }
  0x27   :  { %348 = vmatprep.subr.bf16.mxu1 %v483_v0  ;;  %364 = vmatprep.mubr.msk.bf16.mxu1 %vm484_vm0, %v483_v0  ;;  %v69_v5 = vpack.c.bf16 %v68_v3, %v68_v3  ;;  %v386_v7 = vld [vmem:[#allocation8 + $0x28] sm:$0xff]   ;;  %v387_v8 = vld [vmem:[#allocation8 + $0x20] sm:$0xff]   ;;  %v388_v9 = vld [vmem:[#allocation8 + $0x18] sm:$0xff]   ;;  %s303_s23 = sshll.u32 %s485_s22, 4  ;;  %s304_s23 = int_to_ptr.vmem [resolvable:$true] %s303_s23 }
  0x28   :  { %341 = vmatpush3.bf16.msra.mxu0 %v382_v1  ;;  %349 = vmatpush3.bf16.msra.mxu1 %v384_v4  ;;  %v389_v10 = vld [vmem:[#allocation8 + $0x10] sm:$0xff]   ;;  %v390_v11 = vld [vmem:[#allocation8 + $0x8] sm:$0xff]   ;;  %v391_v12 = vld [vmem:[#allocation8] sm:$0xff]   ;;  %s456_s24 = scalar_lea.vmem %s304_s23, 32  ;;  %p457_p2 = scmp.lt.s32.totalorder %s304_s23, %s304_s23 }
  0x29   :  { %342 = vmatprep.subr.bf16.mxu0 %v483_v0  ;;  %350 = vmatprep.subr.bf16.mxu1 %v483_v0  ;;  %v313_v13 = vld [vmem:[%s555_s2] ss:$0 sm:$0xff] }
  0x2a   :  { %v317_v21 = vld [vmem:[%s557_s4] ss:$0 sm:$0xff]  ;;  %s452_s4 = scalar_lea.vmem %s304_s23, 16 }
  0x2b   :  { %v251_v29 = vld [vmem:[%s558_s5] sm:$0x1]  ;;  %p453_p1 = scmp.ne.s32.totalorder %s304_s23, %s452_s4  ;;  %p458_p3 = scmp.lt.s32.totalorder %s456_s24, %s452_s4 }
  0x2c   :  { %343 = vmatpush3.bf16.msra.mxu0 %v383_v2  ;;  %351 = vmatpush3.bf16.msra.mxu1 %v385_v6 }
  0x2d   :  { %368 = vmatprep.subr.bf16.mxu0 %v483_v0  ;;  %352 = vmatprep.subr.bf16.mxu1 %v483_v0  ;;  %p459_p4 = por %p458_p3, %p457_p2 }
  0x2f   :  { %345 = vmatmul.mubr.msk.bf16.vlgmr.msra.gmra.mxu0 %vm93_vm1, %v69_v5  ;;  %p460_p5 = pnand %p459_p4, %p453_p1 }
  0x30   :  { %370 = vmatprep.mubr.msk.bf16.mxu0 %vm484_vm0, %v483_v0  ;;  %353 = vmatpush3.bf16.msra.mxu1 %v386_v7 }
  0x31   :  { %354 = vmatprep.subr.bf16.mxu1 %v483_v0 }
  0x34   :  { %355 = vmatpush3.bf16.msra.mxu1 %v387_v8 }
  0x35   :  { %356 = vmatprep.subr.bf16.mxu1 %v483_v0 }
  0x38   :  { %357 = vmatpush3.bf16.msra.mxu1 %v388_v9 }
  0x39   :  { %358 = vmatprep.subr.bf16.mxu1 %v483_v0 }
  0x3c   :  { %359 = vmatpush3.bf16.msra.mxu1 %v389_v10 }
  0x3d   :  { %360 = vmatprep.subr.bf16.mxu1 %v483_v0 }
  0x40   :  { %361 = vmatpush3.bf16.msra.mxu1 %v390_v11 }
  0x41   :  { %362 = vmatprep.subr.bf16.mxu1 %v483_v0 }
  0x44   :  { %363 = vmatpush3.bf16.msra.mxu1 %v391_v12 }
  0xef   :  { %v131_v14 = vpop.f32.mrf.mxu0 }
  0xf0   :  { %v132_v15 = vadd.f32 %v313_v13, %v131_v14 }
  0xf1   :  { %v346_v16 = vpop.f32.mrf.mxu0 }
  0xf2   :  { %v137_v17 = vmax.f32 %v132_v15, 0.0 }
  0xf3   :  { %v134_v18 = vpop.f32.mrf.mxu0 }
  0xf4   :  { %v138_v19 = vpack.c.bf16 %v137_v17, %v137_v17 }
  0xf5   :  { %v347_v20 = vpop.f32.mrf.mxu0 }
  0xf6   :  { %365 = vmatmul.mubr.bf16.vlgmr.msra.gmra.mxu1 %v138_v19 }
 0x1b6   :  { %v244_v22 = vpop.f32.mrf.mxu1 }
 0x1b7   :  { %v245_v23 = vadd.f32 %v317_v21, %v244_v22 }
 0x1b8   :  { %v366_v24 = vpop.f32.mrf.mxu1 }
 0x1b9   :  { %v250_v25 = vmax.f32 %v245_v23, 0.0 }
 0x1ba   :  { %v247_v26 = vpop.f32.mrf.mxu1 }
 0x1bb   :  { %v252_v27 = vpack.c.bf16 %v250_v25, %v250_v25 }
 0x1bc   :  { %v367_v28 = vpop.f32.mrf.mxu1 }
 0x1bd   :  { %369 = vmatpush3.bf16.xpose.msra.mxu0 %v252_v27 }
 0x1c4   :  { %371 = vmatmul.mubr.bf16.vlgmr.msra.gmra.mxu0 %v251_v29 }
 0x284   :  { %v289_v31 = vpop.f32.mrf.mxu0 }
 0x285   :  { %v290_v32 = vadd.f32 %v289_v31, %v254_v30 }
 0x286   :  { %v372_v33 = vpop.f32.mrf.mxu0 }
 0x287   :  { %296 = vst.msk [vmem:[#allocation9] sm:$0x1] %vm295_vm2, %v290_v32 }
 0x288   :  { %v292_v34 = vpop.f32.mrf.mxu0 }
 0x289   :  { %463 = shalt.err (!%p460_p5)
}
 0x28a   :  { %306 = dma.vmem_to_hbm [thread:$0]  %s304_s23, 16, %s560_s7, [#allocation5]   ;;  %v373_v35 = vpop.f32.mrf.mxu0 }
 0x28b   :  { %476 = dma.done.wait [#allocation5], 16  }
 0x28c   :  { %477 = vsyncadd [#allocation5], 4294967280 }
 0x28d   :  { %310 = vsyncpa [#allocation4], 1 }
 0x28e   :  { %311 = vsyncpa [#allocation7], 1 }
 0x28f   :  { %312 = vsyncpa [#allocation5], 1 }

</bundles_post_ra>
